<compile_context>
chip_gen: v5e
topology: v5e:2x2
jax: 0.10.0
libtpu: 0.0.40
codegen_flags: <defaults>
</compile_context>

<pallas_src>
import jax
import jax.numpy as jnp
from jax.experimental import pallas as pl
from jax.experimental.pallas import tpu as pltpu


# ----------------------------------------------------------------------------
# Kernels
# ----------------------------------------------------------------------------
def _mlp_resident_kernel(x_ref, w1_ref, b1_ref, w2_ref, b2_ref, o_ref):
    """Weights fully resident in VMEM; one batch tile per grid step."""
    # In-kernel cast of the x tile to the matmul dtype (x stays f32 in HBM).
    xb = x_ref[...].astype(w1_ref.dtype)
    h = jnp.dot(xb, w1_ref[...], preferred_element_type=jnp.float32)      # MXU
    h = jnp.maximum(h + b1_ref[...], 0.0)                                 # f32 VPU epilogue
    y = jnp.dot(h.astype(w2_ref.dtype), w2_ref[...],
                preferred_element_type=jnp.float32)                       # MXU
    o_ref[...] = (y + b2_ref[...]).astype(o_ref.dtype)


def _mlp_streaming_kernel(x_ref, w1_ref, b1_ref, w2_ref, b2_ref, o_ref, acc_ref):
    """Hidden dim streamed in chunks (grid axis 1, 'arbitrary'):
         acc += relu(x @ W1[:, j] + b1[j]) @ W2[j, :]
       Used when the weights do not fit the generation's VMEM budget (v7x)."""
    j = pl.program_id(1)

    @pl.when(j == 0)
    def _init():
        acc_ref[...] = jnp.zeros_like(acc_ref)

    xb = x_ref[...].astype(w1_ref.dtype)
    h = jnp.dot(xb, w1_ref[...], preferred_element_type=jnp.float32)
    h = jnp.maximum(h + b1_ref[...], 0.0)
    acc_ref[...] += jnp.dot(h.astype(w2_ref.dtype), w2_ref[...],
                            preferred_element_type=jnp.float32)

    @pl.when(j == pl.num_programs(1) - 1)
    def _finalize():
        o_ref[...] = (acc_ref[...] + b2_ref[...]).astype(o_ref.dtype)


# ----------------------------------------------------------------------------
# Helpers
# ----------------------------------------------------------------------------
def _round_up(a, m):
    return (a + m - 1) // m * m


_BUFFERED1_OK = None  # decided once (capability probe), never per-call


def _buffered1_supported():
    """One-time, eager probe: does this Mosaic build accept Buffered(1) on a
    constant-index input block?  Decided once; real kernels never run under a
    blanket try/except."""
    global _BUFFERED1_OK
    if _BUFFERED1_OK is None:
        def _copy(a_ref, o_ref):
            o_ref[...] = a_ref[...]
        try:
            probe = pl.pallas_call(
                _copy,
                out_shape=jax.ShapeDtypeStruct((8, 128), jnp.float32),
                grid_spec=pl.GridSpec(
                    grid=(1,),
                    in_specs=[pl.BlockSpec((8, 128), lambda i: (0, 0),
                                           pipeline_mode=pl.Buffered(1))],
                    out_specs=pl.BlockSpec((8, 128), lambda i: (0, 0)),
                ),
            )
            jax.block_until_ready(probe(jnp.zeros((8, 128), jnp.float32)))
            _BUFFERED1_OK = True
        except Exception:   # capability probe only; not hiding real kernel errors
            _BUFFERED1_OK = False
    return _BUFFERED1_OK


def _tpu_vmem_budget_and_cores():
    """(per-kernel VMEM budget bytes, #TensorCores sharing 'parallel' axes)."""
    try:
        cap = int(pltpu.get_tpu_info().vmem_capacity_bytes)
    except Exception:
        cap = None
    if cap is None:                      # unknown part: be conservative (v7x-like)
        return 48 * 2**20, 2
    if cap >= 100 * 2**20:               # v5e / v6e: 128 MiB physical, 1 TC
        return 100 * 2**20, 1
    # v7x: 64 MiB physical, 2 TCs -- leave headroom for Mosaic internal scratch.
    return max(min(cap - 8 * 2**20, 56 * 2**20), 16 * 2**20), 2


def _choose_bm(B, requested_bm, num_cores):
    """Batch tile height: multiple of 128 (MXU height) once B > 128; 16-row
    floor (bf16 sublane packing) for tiny batches; core-balanced step counts."""
    if requested_bm is not None:
        unit = 128 if requested_bm >= 128 else 16
        bm = _round_up(max(requested_bm, 16), unit)
        return min(bm, _round_up(B, unit))
    if B <= 128:
        return _round_up(max(B, 16), 16)
    bm = 512 if B >= 512 * num_cores else 256
    bm = min(bm, _round_up(B, 128))
    if num_cores > 1:
        steps = pl.cdiv(B, bm)
        if steps == 1:
            bm = max(128, _round_up(pl.cdiv(B, num_cores), 128))   # both TCs busy
        elif steps % num_cores:
            # prefer a slightly smaller 128-multiple tile with a balanced count
            for cand in range(bm - 128, 127, -128):
                if pl.cdiv(B, cand) % num_cores == 0:
                    return cand
    return bm


def _steps_for(B, bm, num_cores):
    steps = pl.cdiv(B, bm)
    if num_cores > 1 and steps > 1 and steps % num_cores:
        steps = _round_up(steps, num_cores)    # even step count -> both TCs busy
    return steps


def _resident_vmem_bytes(bm, in_dim, hidden, out_pad, w_item, out_item, weight_bufs):
    weights = weight_bufs * ((in_dim * hidden + hidden * out_pad) * w_item
                             + (hidden + out_pad) * 4)
    io = 2 * bm * in_dim * 4 + 2 * bm * out_pad * out_item
    act = bm * (in_dim * w_item + 4 * hidden + hidden * w_item + 4 * out_pad)
    return weights + io + act


def _streaming_vmem_bytes(bm, in_dim, bk, out_pad, w_item, out_item):
    chunks = 2 * ((in_dim * bk + bk * out_pad) * w_item + bk * 4) + 2 * out_pad * 4
    io = 2 * bm * in_dim * 4 + 2 * bm * out_pad * out_item
    act = bm * (in_dim * w_item + 4 * bk + bk * w_item) + 4 * bm * out_pad  # + acc
    return chunks + io + act


def _const_spec(shape, buffered1):
    """Constant-index block (weights / biases): DMA'd once, held resident;
    single-buffered when the installed Mosaic supports Buffered(1)."""
    if buffered1:
        return pl.BlockSpec(shape, lambda i: (0, 0), pipeline_mode=pl.Buffered(1))
    return pl.BlockSpec(shape, lambda i: (0, 0))


# ----------------------------------------------------------------------------
# Parameter preparation (one-time) and forward pass
# ----------------------------------------------------------------------------
def prepare_params(w1, b1, w2, b2, *, matmul_dtype=jnp.bfloat16):
    """One-time parameter prep (do NOT call per forward step):
       * weights cast once to the MXU matmul dtype (avoids a per-call HBM pass),
       * biases kept in f32 (VPU epilogue),
       * out_dim zero-padded to a multiple of 128 (lane-dense output stores)."""
    in_dim, hidden = w1.shape
    out_dim = w2.shape[1]
    assert w2.shape[0] == hidden
    out_pad = _round_up(max(out_dim, 128), 128)

    w1_c = w1.astype(matmul_dtype)
    w2_c = w2.astype(matmul_dtype)
    b1_c = jnp.reshape(b1, (1, hidden)).astype(jnp.float32)
    b2_c = jnp.reshape(b2, (1, out_dim)).astype(jnp.float32)
    if out_pad != out_dim:
        w2_c = jnp.pad(w2_c, ((0, 0), (0, out_pad - out_dim)))
        b2_c = jnp.pad(b2_c, ((0, 0), (0, out_pad - out_dim)))

    _buffered1_supported()   # decide the Buffered(1) capability once, eagerly
    return dict(w1=w1_c, b1=b1_c, w2=w2_c, b2=b2_c,
                in_dim=in_dim, hidden=hidden, out_dim=out_dim, out_pad=out_pad)


def projection_mlp_forward(x, params, *, bm=None, out_dtype=None,
                           force_path=None, hidden_chunk=None):
    """Forward pass of projection_MLP.  `params` must come from prepare_params().
       force_path: None (auto) | "resident" | "streaming"."""
    B, in_dim = x.shape
    assert in_dim == params["in_dim"]
    hidden, out_dim, out_pad = params["hidden"], params["out_dim"], params["out_pad"]
    w1_c, b1_c, w2_c, b2_c = params["w1"], params["b1"], params["w2"], params["b2"]
    out_dtype = x.dtype if out_dtype is None else out_dtype

    w_item = jnp.dtype(w1_c.dtype).itemsize
    out_item = jnp.dtype(out_dtype).itemsize
    budget, num_cores = _tpu_vmem_budget_and_cores()
    buffered1 = _buffered1_supported()
    weight_bufs = 1 if buffered1 else 2

    bm_eff = _choose_bm(B, bm, num_cores)

    def resident_est(bm_):
        return _resident_vmem_bytes(bm_, in_dim, hidden, out_pad,
                                    w_item, out_item, weight_bufs)

    # ---- path selection (all static / trace-time) ----------------------------
    use_streaming = (force_path == "streaming")
    if not use_streaming:
        while resident_est(bm_eff) * 1.2 > budget and bm_eff > 128:
            bm_eff = max(128, _round_up(bm_eff // 2, 128))
        if force_path is None and resident_est(bm_eff) * 1.2 > budget:
            # Weights themselves exceed the VMEM budget: stream hidden chunks.
            use_streaming = (hidden % 128 == 0)
            # TODO(synk): hidden dims not a multiple of 128 still take the
            # resident path even when over budget (rare for this module).
    if use_streaming:
        while (_streaming_vmem_bytes(bm_eff, in_dim, 128, out_pad, w_item,
                                     out_item) * 1.2 > budget and bm_eff > 128):
            bm_eff = max(128, _round_up(bm_eff // 2, 128))

    steps = _steps_for(B, bm_eff, num_cores)
    B_pad = steps * bm_eff

    x_in = x if B_pad == B else jnp.pad(x, ((0, B_pad - B), (0, 0)))

    cost = pl.CostEstimate(
        flops=2 * B_pad * hidden * (in_dim + out_pad),
        transcendentals=0,
        bytes_accessed=(B_pad * in_dim * x.dtype.itemsize
                        + (in_dim * hidden + hidden * out_pad) * w_item
                        + (hidden + out_pad) * 4
                        + B_pad * out_pad * out_item))

    if not use_streaming:
        est = resident_est(bm_eff)
        vmem_limit = int(min(budget, max(1.3 * est, 32 * 2**20)))
        y_pad = pl.pallas_call(
            _mlp_resident_kernel,
            out_shape=jax.ShapeDtypeStruct((B_pad, out_pad), out_dtype),
            grid_spec=pl.GridSpec(
                grid=(steps,),
                in_specs=[
                    pl.BlockSpec((bm_eff, in_dim), lambda i: (i, 0)),   # x (f32)
                    _const_spec((in_dim, hidden), buffered1),           # W1 resident
                    _const_spec((1, hidden), buffered1),                # b1
                    _const_spec((hidden, out_pad), buffered1),          # W2 resident
                    _const_spec((1, out_pad), buffered1),               # b2
                ],
                out_specs=pl.BlockSpec((bm_eff, out_pad), lambda i: (i, 0)),
            ),
            compiler_params=pltpu.CompilerParams(
                dimension_semantics=("parallel",),
                vmem_limit_bytes=vmem_limit),
            cost_estimate=cost,
        )(x_in, w1_c, b1_c, w2_c, b2_c)
    else:
        # ---- hidden-chunk streaming path -------------------------------------
        if hidden_chunk is not None:
            bk = int(hidden_chunk)
            assert bk % 128 == 0 and hidden % bk == 0, "hidden_chunk must divide hidden and be a 128 multiple"
        else:
            bk = None
            for cand in (512, 256, 128):
                if hidden % cand == 0:
                    fits = (_streaming_vmem_bytes(bm_eff, in_dim, cand, out_pad,
                                                  w_item, out_item) * 1.2 <= budget)
                    if fits or cand == 128:
                        bk = cand
                        break
            if bk is None:
                raise ValueError("streaming path requires hidden % 128 == 0")
        n_chunks = hidden // bk
        est = _streaming_vmem_bytes(bm_eff, in_dim, bk, out_pad, w_item, out_item)
        vmem_limit = int(min(budget, max(1.3 * est, 32 * 2**20)))
        y_pad = pl.pallas_call(
            _mlp_streaming_kernel,
            out_shape=jax.ShapeDtypeStruct((B_pad, out_pad), out_dtype),
            grid_spec=pltpu.PrefetchScalarGridSpec(
                num_scalar_prefetch=0,
                grid=(steps, n_chunks),
                in_specs=[
                    # same block index across j -> x DMA'd once per batch tile
                    pl.BlockSpec((bm_eff, in_dim), lambda i, j: (i, 0)),
                    pl.BlockSpec((in_dim, bk), lambda i, j: (0, j)),     # W1 chunk
                    pl.BlockSpec((1, bk), lambda i, j: (0, j)),          # b1 chunk
                    pl.BlockSpec((bk, out_pad), lambda i, j: (j, 0)),    # W2 chunk
                    pl.BlockSpec((1, out_pad), lambda i, j: (0, 0)),     # b2
                ],
                out_specs=pl.BlockSpec((bm_eff, out_pad), lambda i, j: (i, 0)),
                scratch_shapes=[pltpu.VMEM((bm_eff, out_pad), jnp.float32)],
            ),
            compiler_params=pltpu.CompilerParams(
                dimension_semantics=("parallel", "arbitrary"),
                vmem_limit_bytes=vmem_limit),
            cost_estimate=cost,
        )(x_in, w1_c, b1_c, w2_c, b2_c)

    y = y_pad
    if out_pad != out_dim:
        y = y[:, :out_dim]
    if B_pad != B:
        y = y[:B]
    return y


# ----------------------------------------------------------------------------
# Reference / init (PyTorch-equivalent)
# ----------------------------------------------------------------------------
def init_params(key, in_dim, out_dim=256, dtype=jnp.float32):
    """PyTorch-style (uniform +/- 1/sqrt(fan_in)) init; weights pre-transposed
    to (in_features, out_features)."""
    hidden_dim = in_dim
    k1, k2, k3, k4 = jax.random.split(key, 4)
    bound1 = 1.0 / jnp.sqrt(in_dim)
    bound2 = 1.0 / jnp.sqrt(hidden_dim)
    w1 = jax.random.uniform(k1, (in_dim, hidden_dim), dtype, -bound1, bound1)
    b1 = jax.random.uniform(k2, (1, hidden_dim), dtype, -bound1, bound1)
    w2 = jax.random.uniform(k3, (hidden_dim, out_dim), dtype, -bound2, bound2)
    b2 = jax.random.uniform(k4, (1, out_dim), dtype, -bound2, bound2)
    return w1, b1, w2, b2


def reference_forward(x, w1, b1, w2, b2, *, matmul_dtype=None):
    """Pure-JAX reference.  With matmul_dtype=bf16 it mirrors the kernel's
    bf16-matmul / f32-accumulation numerics."""
    if matmul_dtype is None:
        h = jnp.maximum(x @ w1 + b1.reshape(1, -1), 0.0)
        return h @ w2 + b2.reshape(1, -1)
    xc, w1c, w2c = (a.astype(matmul_dtype) for a in (x, w1, w2))
    h = jnp.dot(xc, w1c, preferred_element_type=jnp.float32) + b1.reshape(1, -1)
    h = jnp.maximum(h, 0.0)
    y = jnp.dot(h.astype(matmul_dtype), w2c, preferred_element_type=jnp.float32)
    return y + b2.reshape(1, -1)


# ----------------------------------------------------------------------------
# Self-test
# ----------------------------------------------------------------------------
if __name__ == "__main__":
    key = jax.random.PRNGKey(0)
    kx1, kp1, kx2, kp2 = jax.random.split(key, 4)

    # --- Test 1: resident-weights path (batch not a tile multiple) -----------
    batch, in_dim, out_dim = 24, 128, 256          # hidden_dim = in_dim per module
    x = jax.random.normal(kx1, (batch, in_dim), dtype=jnp.float32)
    w1, b1, w2, b2 = init_params(kp1, in_dim, out_dim)
    params = prepare_params(w1, b1, w2, b2)        # one-time bf16 cast of weights

    y = jax.block_until_ready(projection_mlp_forward(x, params))
    assert y.shape == (batch, out_dim)
    y_ref = reference_forward(x, w1, b1, w2, b2, matmul_dtype=jnp.bfloat16)
    assert jnp.allclose(y, y_ref, atol=5e-3, rtol=5e-3), "resident path mismatch"
    y_f32 = reference_forward(x, w1, b1, w2, b2)
    assert float(jnp.max(jnp.abs(y - y_f32))) < 0.25, "bf16 error larger than expected"

    # --- Test 2: hidden-chunk streaming path (large-hidden / v7x fallback) ---
    batch2, in_dim2, out_dim2 = 16, 256, 256
    x2 = jax.random.normal(kx2, (batch2, in_dim2), dtype=jnp.float32)
    w1b, b1b, w2b, b2b = init_params(kp2, in_dim2, out_dim2)
    params2 = prepare_params(w1b, b1b, w2b, b2b)
    y2 = jax.block_until_ready(
        projection_mlp_forward(x2, params2, force_path="streaming", hidden_chunk=128))
    assert y2.shape == (batch2, out_dim2)
    y2_ref = reference_forward(x2, w1b, b1b, w2b, b2b, matmul_dtype=jnp.bfloat16)
    assert jnp.allclose(y2, y2_ref, atol=5e-3, rtol=5e-3), "streaming path mismatch"

    print("KERNEL_OK")
</pallas_src>

<mosaic_0001>
module attributes {stable_mosaic.version = 11 : i64} {
  func.func @_copy(%arg0: i32, %arg1: memref<8x128xf32, #tpu.memory_space<vmem>>, %arg2: memref<8x128xf32, #tpu.memory_space<vmem>>) attributes {dimension_semantics = [#tpu.dimension_semantics<arbitrary>], iteration_bounds = array<i64: 1>, scalar_prefetch = 0 : i64, scratch_operands = 0 : i64, tpu.core_type = #tpu.core_type<tc>, window_params = [{pipeline_mode = #tpu.pipeline_mode<synchronous>, transform_indices = @transform_0, window_bounds = array<i64: 8, 128>}, {pipeline_mode = #tpu.pipeline_mode<synchronous>, transform_indices = @transform_1, window_bounds = array<i64: 8, 128>}]} {
    %c0 = arith.constant 0 : index
    %c0_0 = arith.constant 0 : index
    %0 = vector.load %arg1[%c0, %c0_0] : memref<8x128xf32, #tpu.memory_space<vmem>>, vector<8x128xf32>
    %c0_1 = arith.constant 0 : index
    %c0_2 = arith.constant 0 : index
    %1 = vector.load %arg2[%c0_1, %c0_2] : memref<8x128xf32, #tpu.memory_space<vmem>>, vector<8x128xf32>
    tpu.vector_store %arg2[%c0_1, %c0_2], %0 {strides = array<i32>} : memref<8x128xf32, #tpu.memory_space<vmem>>, vector<8x128xf32>,
    return
  }
  func.func @transform_0(%arg0: i32) -> (i32, i32) {
    %c0_i32 = arith.constant 0 : i32
    %c0_i32_0 = arith.constant 0 : i32
    %c0_i32_1 = arith.constant 0 : i32
    return %c0_i32, %c0_i32_0 : i32, i32
  }
  func.func @transform_1(%arg0: i32) -> (i32, i32) {
    %c0_i32 = arith.constant 0 : i32
    %c0_i32_0 = arith.constant 0 : i32
    %c0_i32_1 = arith.constant 0 : i32
    return %c0_i32, %c0_i32_0 : i32, i32
  }
}

module attributes {stable_mosaic.version = 11 : i64} {
  func.func @_mlp_resident_kernel(%arg0: i32, %arg1: memref<32x128xf32, #tpu.memory_space<vmem>>, %arg2: memref<128x128xbf16, #tpu.memory_space<vmem>>, %arg3: memref<1x128xf32, #tpu.memory_space<vmem>>, %arg4: memref<128x256xbf16, #tpu.memory_space<vmem>>, %arg5: memref<1x256xf32, #tpu.memory_space<vmem>>, %arg6: memref<32x256xf32, #tpu.memory_space<vmem>>) attributes {dimension_semantics = [#tpu.dimension_semantics<parallel>], iteration_bounds = array<i64: 1>, scalar_prefetch = 0 : i64, scratch_operands = 0 : i64, tpu.core_type = #tpu.core_type<tc>, window_params = [{transform_indices = @transform_0, window_bounds = array<i64: 32, 128>}, {pipeline_mode = #tpu.pipeline_mode<synchronous>, transform_indices = @transform_1, window_bounds = array<i64: 128, 128>}, {pipeline_mode = #tpu.pipeline_mode<synchronous>, transform_indices = @transform_2, window_bounds = array<i64: 1, 128>}, {pipeline_mode = #tpu.pipeline_mode<synchronous>, transform_indices = @transform_3, window_bounds = array<i64: 128, 256>}, {pipeline_mode = #tpu.pipeline_mode<synchronous>, transform_indices = @transform_4, window_bounds = array<i64: 1, 256>}, {transform_indices = @transform_5, window_bounds = array<i64: 32, 256>}]} {
    %c0 = arith.constant 0 : index
    %c0_0 = arith.constant 0 : index
    %0 = vector.load %arg1[%c0, %c0_0] : memref<32x128xf32, #tpu.memory_space<vmem>>, vector<32x128xf32>
    %1 = arith.truncf %0 : vector<32x128xf32> to vector<32x128xbf16>
    %c0_1 = arith.constant 0 : index
    %c0_2 = arith.constant 0 : index
    %2 = vector.load %arg2[%c0_1, %c0_2] : memref<128x128xbf16, #tpu.memory_space<vmem>>, vector<128x128xbf16>
    %cst = arith.constant dense<0.000000e+00> : vector<32x128xf32>
    %3 = tpu.matmul %1, %2, %cst {dimension_numbers = #tpu.dot_dimension_numbers<[1], [0], [0], [1], [0, 0, 1, 1], [], []>} : vector<32x128xbf16>, vector<128x128xbf16>, vector<32x128xf32> -> vector<32x128xf32>
    %c0_3 = arith.constant 0 : index
    %c0_4 = arith.constant 0 : index
    %4 = vector.load %arg3[%c0_3, %c0_4] : memref<1x128xf32, #tpu.memory_space<vmem>>, vector<1x128xf32>
    %5 = vector.broadcast %4 : vector<1x128xf32> to vector<32x128xf32>
    %6 = arith.addf %3, %5 : vector<32x128xf32>
    %cst_5 = arith.constant 0.000000e+00 : f32
    %7 = vector.broadcast %cst_5 : f32 to vector<32x128xf32>
    %8 = arith.maximumf %6, %7 : vector<32x128xf32>
    %9 = arith.truncf %8 : vector<32x128xf32> to vector<32x128xbf16>
    %c0_6 = arith.constant 0 : index
    %c0_7 = arith.constant 0 : index
    %10 = vector.load %arg4[%c0_6, %c0_7] : memref<128x256xbf16, #tpu.memory_space<vmem>>, vector<128x256xbf16>
    %cst_8 = arith.constant dense<0.000000e+00> : vector<32x256xf32>
    %11 = tpu.matmul %9, %10, %cst_8 {dimension_numbers = #tpu.dot_dimension_numbers<[1], [0], [0], [1], [0, 0, 1, 1], [], []>} : vector<32x128xbf16>, vector<128x256xbf16>, vector<32x256xf32> -> vector<32x256xf32>
    %c0_9 = arith.constant 0 : index
    %c0_10 = arith.constant 0 : index
    %12 = vector.load %arg5[%c0_9, %c0_10] : memref<1x256xf32, #tpu.memory_space<vmem>>, vector<1x256xf32>
    %13 = vector.broadcast %12 : vector<1x256xf32> to vector<32x256xf32>
    %14 = arith.addf %11, %13 : vector<32x256xf32>
    %c0_11 = arith.constant 0 : index
    %c0_12 = arith.constant 0 : index
    %15 = vector.load %arg6[%c0_11, %c0_12] : memref<32x256xf32, #tpu.memory_space<vmem>>, vector<32x256xf32>
    tpu.vector_store %arg6[%c0_11, %c0_12], %14 {strides = array<i32>} : memref<32x256xf32, #tpu.memory_space<vmem>>, vector<32x256xf32>,
    return
  }
  func.func @transform_0(%arg0: i32) -> (i32, i32) {
    %c0_i32 = arith.constant 0 : i32
    %c0_i32_0 = arith.constant 0 : i32
    return %arg0, %c0_i32 : i32, i32
  }
  func.func @transform_1(%arg0: i32) -> (i32, i32) {
    %c0_i32 = arith.constant 0 : i32
    %c0_i32_0 = arith.constant 0 : i32
    %c0_i32_1 = arith.constant 0 : i32
    return %c0_i32, %c0_i32_0 : i32, i32
  }
  func.func @transform_2(%arg0: i32) -> (i32, i32) {
    %c0_i32 = arith.constant 0 : i32
    %c0_i32_0 = arith.constant 0 : i32
    %c0_i32_1 = arith.constant 0 : i32
    return %c0_i32, %c0_i32_0 : i32, i32
  }
  func.func @transform_3(%arg0: i32) -> (i32, i32) {
    %c0_i32 = arith.constant 0 : i32
    %c0_i32_0 = arith.constant 0 : i32
    %c0_i32_1 = arith.constant 0 : i32
    return %c0_i32, %c0_i32_0 : i32, i32
  }
  func.func @transform_4(%arg0: i32) -> (i32, i32) {
    %c0_i32 = arith.constant 0 : i32
    %c0_i32_0 = arith.constant 0 : i32
    %c0_i32_1 = arith.constant 0 : i32
    return %c0_i32, %c0_i32_0 : i32, i32
  }
  func.func @transform_5(%arg0: i32) -> (i32, i32) {
    %c0_i32 = arith.constant 0 : i32
    %c0_i32_0 = arith.constant 0 : i32
    return %arg0, %c0_i32 : i32, i32
  }
}

</mosaic_0001>

<bundles_post_ra>
// kernel: tpu_custom_call.1
= control target key start
LH: loop header
LB: loop body
LE: loop exit
PB: predicated region body
PF: predicated region fallthrough
CT: control target
= control target key end

     0   :  { %6 = vsyncpa [#allocation3], 0  ;;  %s114_s0 = inlined_call_operand.hbm [shape: f32[8,128], index: 0, kind: input, shape index: {}]   ;;  %s115_s1 = inlined_call_operand.hbm [shape: f32[8,128], index: 1, kind: output, shape index: {}]  }
   0x1   :  { %7 = vsyncpa [#allocation4], 0  ;;  %s13_s8 = sshll.u32 %s114_s0, 4  ;;  %s96_s9 = smov [#allocation2]   ;;  %s14_s8 = int_to_ptr.hbm [resolvable:$true] %s13_s8 }
   0x2   :  { %s15_s10 = sshll.u32 %s96_s9, 4  ;;  %s16_s10 = int_to_ptr.vmem [resolvable:$true] %s15_s10 }
   0x3   :  { %18 = dma.hbm_to_vmem [thread:$0]  %s14_s8, 128, %s16_s10, [#allocation3]  }
   0x4   :  { %92 = dma.done.wait [#allocation3], 128  }
   0x5   :  { %93 = vsyncadd [#allocation3], 4294967168  ;;  %s97_s11 = smov [#allocation5]   ;;  %s32_s15 = sshll.u32 %s115_s1, 4  ;;  %v23_v0 = vld [vmem:[#allocation2] sm:$0xff]  ;;  %s33_s15 = int_to_ptr.hbm [resolvable:$true] %s32_s15 }
   0x6   :  { %s30_s12 = sshll.u32 %s97_s11, 4  ;;  %24 = vst [vmem:[#allocation5] sm:$0xff] %v23_v0  ;;  %s31_s12 = int_to_ptr.vmem [resolvable:$true] %s30_s12 }
   0x7   :  { %35 = dma.vmem_to_hbm [thread:$0]  %s31_s12, 128, %s33_s15, [#allocation4]  }
   0x8   :  { %94 = dma.done.wait [#allocation4], 128  }
   0x9   :  { %95 = vsyncadd [#allocation4], 4294967168 }
   0xa   :  { %40 = vsyncpa [#allocation3], 1 }
   0xb   :  { %41 = vsyncpa [#allocation4], 1 }

// kernel: tpu_custom_call.1
= control target key start
LH: loop header
LB: loop body
LE: loop exit
PB: predicated region body
PF: predicated region fallthrough
CT: control target
= control target key end

     0   :  { %10 = vsyncpa [#allocation3], 0  ;;  %s634_s0 = inlined_call_operand.hbm [shape: f32[32,128], index: 0, kind: input, shape index: {}]   ;;  %s635_s1 = inlined_call_operand.hbm [shape: bf16[128,128], index: 1, kind: input, shape index: {}]   ;;  %s636_s2 = inlined_call_operand.vmem [shape: f32[1,128], index: 2, kind: input, shape index: {}]   ;;  %s637_s3 = inlined_call_operand.hbm [shape: bf16[128,256], index: 3, kind: input, shape index: {}]   ;;  %s638_s4 = inlined_call_operand.vmem [shape: f32[1,256], index: 4, kind: input, shape index: {}]   ;;  %s639_s5 = inlined_call_operand.hbm [shape: f32[32,256], index: 5, kind: output, shape index: {}]  }
   0x1   :  { %11 = vsyncpa [#allocation6], 0  ;;  %s30_s20 = sshll.u32 %s635_s1, 4  ;;  %s31_s20 = int_to_ptr.hbm [resolvable:$true] %s30_s20 }
   0x2   :  { %12 = vsyncpa [#allocation4], 0  ;;  %s576_s21 = smov [#allocation5]   ;;  %s17_s25 = sshll.u32 %s634_s0, 4  ;;  %s18_s25 = int_to_ptr.hbm [resolvable:$true] %s17_s25 }
   0x3   :  { %s32_s22 = sshll.u32 %s576_s21, 4  ;;  %s577_s26 = smov 64   ;;  %s33_s22 = int_to_ptr.vmem [resolvable:$true] %s32_s22 }
   0x4   :  { %s578_s27 = smov 4   ;;  %s579_s28 = smov [#allocation2]  }
   0x5   :  { %38 = dma.hbm_to_vmem [thread:$0]  %s31_s20, 1024, %s33_s22, [#allocation6], %s577_s26, %s577_s26, %s578_s27  }
   0x6   :  { %s19_s29 = sshll.u32 %s579_s28, 4  ;;  %s580_s30 = smov 128   ;;  %s20_s29 = int_to_ptr.vmem [resolvable:$true] %s19_s29 }
   0x7   :  { %s581_s6 = smov 8   ;;  %s45_s8 = sshll.u32 %s637_s3, 4  ;;  %s46_s8 = int_to_ptr.hbm [resolvable:$true] %s45_s8 }
   0x8   :  { %25 = dma.hbm_to_vmem [thread:$0]  %s18_s25, 512, %s20_s29, [#allocation3], %s580_s30, %s580_s30, %s581_s6  }
   0x9   :  { %s582_s9 = smov [#allocation7]  }
   0xa   :  { %s47_s10 = sshll.u32 %s582_s9, 4  ;;  %s48_s10 = int_to_ptr.vmem [resolvable:$true] %s47_s10 }
   0xb   :  { %53 = dma.hbm_to_vmem [thread:$0]  %s46_s8, 2048, %s48_s10, [#allocation6], %s580_s30, %s580_s30, %s581_s6  }
   0xc   :  { %570 = dma.done.wait [#allocation3], 512  }
   0xd   :  { %571 = vsyncadd [#allocation3], 4294966784 }
   0xe   :  { %572 = dma.done.wait [#allocation6], 3072  }
   0xf   :  { %573 = vsyncadd [#allocation6], 4294964224  ;;  %v438_v0 = vld [vmem:[#allocation5 + $0x38] sm:$0xff]  ;;  %v437_v1 = vld [vmem:[#allocation5 + $0x30] sm:$0xff]  ;;  %s321_s15 = sshll.u32 %s639_s5, 4  ;;  %s584_s16 = smov 256   ;;  %s322_s15 = int_to_ptr.hbm [resolvable:$true] %s321_s15 }
  0x10   :  { %142 = vmatpush.bf16.msra.mxu0 %v438_v0  ;;  %455 = vmatpush.bf16.msra.mxu3 %v438_v0  ;;  %v425_v2 = vld [vmem:[#allocation7 + $0x70] sm:$0xf]  ;;  %v454_v3 = vld [vmem:[#allocation7 + $0x74] sm:$0xf0]  ;;  %v453_v4 = vld [vmem:[#allocation7 + $0x74] sm:$0xf] }
  0x11   :  { %v426_v5 = vor.u32 %v454_v3, %v425_v2  ;;  %v427_v6 = vld [vmem:[#allocation7 + $0x78] sm:$0xf0]  ;;  %v417_v7 = vld [vmem:[#allocation7 + $0x60] sm:$0xf]  ;;  %v452_v8 = vld [vmem:[#allocation7 + $0x64] sm:$0xf0] }
  0x12   :  { %v436_v9 = vld [vmem:[#allocation5 + $0x28] sm:$0xff]  ;;  %v430_v10 = vor.u32 %v453_v4, %v427_v6  ;;  %v451_v11 = vld [vmem:[#allocation7 + $0x64] sm:$0xf]  ;;  %v418_v13 = vor.u32 %v452_v8, %v417_v7  ;;  %v409_v15 = vld [vmem:[#allocation7 + $0x50] sm:$0xf]  ;;  %s585_s17 = smov 16  }
  0x13   :  { %v419_v12 = vld [vmem:[#allocation7 + $0x68] sm:$0xf0]  ;;  %269 = vmatpush.bf16.msra.mxu1 %v426_v5  ;;  %v450_v16 = vld [vmem:[#allocation7 + $0x54] sm:$0xf0]  ;;  %v449_v17 = vld [vmem:[#allocation7 + $0x54] sm:$0xf] }
  0x14   :  { %143 = vmatpush.bf16.msra.mxu0 %v437_v1  ;;  %456 = vmatpush.bf16.msra.mxu3 %v437_v1  ;;  %v422_v14 = vor.u32 %v451_v11, %v419_v12  ;;  %v411_v18 = vld [vmem:[#allocation7 + $0x58] sm:$0xf0]  ;;  %v435_v19 = vld [vmem:[#allocation5 + $0x20] sm:$0xff]  ;;  %v410_v20 = vor.u32 %v450_v16, %v409_v15  ;;  %v448_v23 = vld [vmem:[#allocation7 + $0x44] sm:$0xf0] }
  0x15   :  { %288 = vmatpush.bf16.msra.mxu2 %v430_v10  ;;  %v414_v21 = vor.u32 %v449_v17, %v411_v18  ;;  %v401_v22 = vld [vmem:[#allocation7 + $0x40] sm:$0xf]  ;;  %v447_v24 = vld [vmem:[#allocation7 + $0x44] sm:$0xf]  ;;  %v403_v25 = vld [vmem:[#allocation7 + $0x48] sm:$0xf0] }
  0x16   :  { %v434_v26 = vld [vmem:[#allocation5 + $0x18] sm:$0xff]  ;;  %v402_v27 = vor.u32 %v448_v23, %v401_v22  ;;  %v406_v28 = vor.u32 %v447_v24, %v403_v25  ;;  %v433_v29 = vld [vmem:[#allocation5 + $0x10] sm:$0xff]  ;;  %v432_v30 = vld [vmem:[#allocation5 + $0x8] sm:$0xff] }
  0x17   :  { %270 = vmatpush.bf16.msra.mxu1 %v418_v13  ;;  %v431_v31 = vld [vmem:[#allocation5] sm:$0xff]  ;;  %v69_v33 = vld [vmem:[#allocation2 + $0x8] sm:$0xff]  ;;  %v70_v34 = vld [vmem:[#allocation2 + $0x10] sm:$0xff] }
  0x18   :  { %144 = vmatpush.bf16.msra.mxu0 %v436_v9  ;;  %457 = vmatpush.bf16.msra.mxu3 %v436_v9  ;;  %v68_v32 = vld [vmem:[#allocation2] sm:$0xff]  ;;  %v71_v35 = vld [vmem:[#allocation2 + $0x18] sm:$0xff]  ;;  %v393_v38 = vld [vmem:[#allocation7 + $0x30] sm:$0xf] }
  0x19   :  { %289 = vmatpush.bf16.msra.mxu2 %v422_v14  ;;  %v72_v36 = vpack.c.bf16 %v69_v33, %v68_v32  ;;  %v73_v37 = vpack.c.bf16 %v71_v35, %v70_v34  ;;  %v446_v39 = vld [vmem:[#allocation7 + $0x34] sm:$0xf0]  ;;  %v445_v40 = vld [vmem:[#allocation7 + $0x34] sm:$0xf]  ;;  %v395_v42 = vld [vmem:[#allocation7 + $0x38] sm:$0xf0] }
  0x1a   :  { %v394_v41 = vor.u32 %v446_v39, %v393_v38  ;;  %v398_v43 = vor.u32 %v445_v40, %v395_v42  ;;  %v385_v44 = vld [vmem:[#allocation7 + $0x20] sm:$0xf]  ;;  %v444_v45 = vld [vmem:[#allocation7 + $0x24] sm:$0xf0]  ;;  %v443_v46 = vld [vmem:[#allocation7 + $0x24] sm:$0xf] }
  0x1b   :  { %271 = vmatpush.bf16.msra.mxu1 %v410_v20  ;;  %v386_v47 = vor.u32 %v444_v45, %v385_v44  ;;  %v387_v48 = vld [vmem:[#allocation7 + $0x28] sm:$0xf0]  ;;  %v377_v50 = vld [vmem:[#allocation7 + $0x10] sm:$0xf]  ;;  %v442_v51 = vld [vmem:[#allocation7 + $0x14] sm:$0xf0] }
  0x1c   :  { %145 = vmatpush.bf16.msra.mxu0 %v435_v19  ;;  %458 = vmatpush.bf16.msra.mxu3 %v435_v19  ;;  %v390_v49 = vor.u32 %v443_v46, %v387_v48  ;;  %v441_v52 = vld [vmem:[#allocation7 + $0x14] sm:$0xf]  ;;  %v378_v53 = vor.u32 %v442_v51, %v377_v50  ;;  %v379_v54 = vld [vmem:[#allocation7 + $0x18] sm:$0xf0]  ;;  %v369_v56 = vld [vmem:[#allocation7] sm:$0xf] }
  0x1d   :  { %290 = vmatpush.bf16.msra.mxu2 %v414_v21  ;;  %v382_v55 = vor.u32 %v441_v52, %v379_v54  ;;  %v440_v57 = vld [vmem:[#allocation7 + $0x4] sm:$0xf0]  ;;  %v439_v58 = vld [vmem:[#allocation7 + $0x4] sm:$0xf]  ;;  %v371_v60 = vld [vmem:[#allocation7 + $0x8] sm:$0xf0] }
  0x1e   :  { %v370_v59 = vor.u32 %v440_v57, %v369_v56  ;;  %v374_v61 = vor.u32 %v439_v58, %v371_v60  ;;  %v473_v63 = vld [vmem:[%s636_s2] ss:$0 sm:$0xff]  ;;  %s583_s2 = smov [#allocation8]  }
  0x1f   :  { %272 = vmatpush.bf16.msra.mxu1 %v402_v27  ;;  %v183_v13 = vld [vmem:[%s638_s4] sm:$0x3]  ;;  %s319_s4 = sshll.u32 %s583_s2, 4  ;;  %s320_s4 = int_to_ptr.vmem [resolvable:$true] %s319_s4 }
  0x20   :  { %146 = vmatpush.bf16.msra.mxu0 %v434_v26  ;;  %459 = vmatpush.bf16.msra.mxu3 %v434_v26  ;;  %v185_v14 = vperm.slane %v183_v13, 0  ;;  %v186_v17 = vperm.slane %v183_v13, 1 }
  0x21   :  { %291 = vmatpush.bf16.msra.mxu2 %v406_v28 }
  0x23   :  { %273 = vmatpush.bf16.msra.mxu1 %v394_v41 }
  0x24   :  { %147 = vmatpush.bf16.msra.mxu0 %v433_v29  ;;  %460 = vmatpush.bf16.msra.mxu3 %v433_v29 }
  0x25   :  { %292 = vmatpush.bf16.msra.mxu2 %v398_v43 }
  0x27   :  { %274 = vmatpush.bf16.msra.mxu1 %v386_v47 }
  0x28   :  { %148 = vmatpush.bf16.msra.mxu0 %v432_v30  ;;  %461 = vmatpush.bf16.msra.mxu3 %v432_v30 }
  0x29   :  { %293 = vmatpush.bf16.msra.mxu2 %v390_v49 }
  0x2b   :  { %275 = vmatpush.bf16.msra.mxu1 %v378_v53 }
  0x2c   :  { %149 = vmatpush.bf16.msra.mxu0 %v431_v31  ;;  %462 = vmatpush.bf16.msra.mxu3 %v431_v31 }
  0x2d   :  { %294 = vmatpush.bf16.msra.mxu2 %v382_v55 }
  0x2f   :  { %150 = vmatmul.bf16.vlgmr.msra.gmra.mxu0 %v72_v36  ;;  %155 = vmatmul.bf16.vlgmr.msra.gmra.mxu3 %v73_v37 }
  0x30   :  { %276 = vmatpush.bf16.msra.mxu1 %v370_v59 }
  0x31   :  { %295 = vmatpush.bf16.msra.mxu2 %v374_v61 }
  0xac   :  { %v151_v62 = vpop.f32.mrf.mxu0 }
  0xad   :  { %v152_v0 = vadd.f32 %v473_v63, %v151_v62 }
  0xaf   :  { %v161_v4 = vmax.f32 %v152_v0, 0.0 }
  0xb2   :  { %v156_v2 = vpop.f32.mrf.mxu3 }
  0xb3   :  { %v157_v8 = vadd.f32 %v473_v63, %v156_v2 }
  0xb4   :  { %v153_v1 = vpop.f32.mrf.mxu0 }
  0xb5   :  { %v154_v3 = vadd.f32 %v473_v63, %v153_v1  ;;  %v163_v10 = vmax.f32 %v157_v8, 0.0 }
  0xb7   :  { %v162_v5 = vmax.f32 %v154_v3, 0.0 }
  0xb9   :  { %v165_v6 = vpack.c.bf16 %v162_v5, %v161_v4 }
  0xba   :  { %v158_v7 = vpop.f32.mrf.mxu3 }
  0xbb   :  { %277 = vmatmul.bf16.vlgmr.msra.gmra.mxu1 %v165_v6  ;;  %296 = vmatmul.bf16.vlgmr.msra.gmra.mxu2 %v165_v6  ;;  %v159_v9 = vadd.f32 %v473_v63, %v158_v7 }
  0xbd   :  { %v164_v11 = vmax.f32 %v159_v9, 0.0 }
  0xbf   :  { %v166_v12 = vpack.c.bf16 %v164_v11, %v163_v10 }
  0xcb   :  { %282 = vmatmul.bf16.gmra.mxu1 %v166_v12  ;;  %301 = vmatmul.bf16.gmra.mxu2 %v166_v12 }
 0x138   :  { %v278_v15 = vpop.f32.mrf.mxu1 }
 0x139   :  { %v279_v16 = vadd.f32 %v278_v15, %v185_v14 }
 0x13b   :  { %307 = vst [vmem:[#allocation8] sm:$0xff] %v279_v16 }
 0x13e   :  { %v297_v18 = vpop.f32.mrf.mxu2 }
 0x13f   :  { %v298_v19 = vadd.f32 %v297_v18, %v186_v17 }
 0x140   :  { %v280_v20 = vpop.f32.mrf.mxu1 }
 0x141   :  { %308 = vst [vmem:[#allocation8 + $0x8] sm:$0xff] %v298_v19  ;;  %v281_v21 = vadd.f32 %v280_v20, %v185_v14 }
 0x143   :  { %309 = vst [vmem:[#allocation8 + $0x10] sm:$0xff] %v281_v21 }
 0x146   :  { %v299_v22 = vpop.f32.mrf.mxu2 }
 0x147   :  { %v300_v23 = vadd.f32 %v299_v22, %v186_v17 }
 0x148   :  { %v283_v24 = vpop.f32.mrf.mxu1 }
 0x149   :  { %310 = vst [vmem:[#allocation8 + $0x18] sm:$0xff] %v300_v23  ;;  %v284_v25 = vadd.f32 %v283_v24, %v185_v14 }
 0x14b   :  { %311 = vst [vmem:[#allocation8 + $0x20] sm:$0xff] %v284_v25 }
 0x14e   :  { %v302_v26 = vpop.f32.mrf.mxu2 }
 0x14f   :  { %v303_v27 = vadd.f32 %v302_v26, %v186_v17 }
 0x150   :  { %v285_v28 = vpop.f32.mrf.mxu1 }
 0x151   :  { %312 = vst [vmem:[#allocation8 + $0x28] sm:$0xff] %v303_v27  ;;  %v286_v29 = vadd.f32 %v285_v28, %v185_v14 }
 0x153   :  { %313 = vst [vmem:[#allocation8 + $0x30] sm:$0xff] %v286_v29 }
 0x156   :  { %v304_v30 = vpop.f32.mrf.mxu2 }
 0x157   :  { %v305_v31 = vadd.f32 %v304_v30, %v186_v17 }
 0x159   :  { %314 = vst [vmem:[#allocation8 + $0x38] sm:$0xff] %v305_v31 }
 0x15a   :  { %327 = dma.vmem_to_hbm [thread:$0]  %s320_s4, 1024, %s322_s15, [#allocation4], %s584_s16, %s584_s16, %s585_s17  }
 0x15b   :  { %574 = dma.done.wait [#allocation4], 1024  }
 0x15c   :  { %575 = vsyncadd [#allocation4], 4294966272 }
 0x15d   :  { %332 = vsyncpa [#allocation3], 1 }
 0x15e   :  { %333 = vsyncpa [#allocation6], 1 }
 0x15f   :  { %334 = vsyncpa [#allocation4], 1 }

</bundles_post_ra>
